<compile_context>
chip_gen: v7x
topology: tpu7x:2x2x1
jax: 0.10.0
libtpu: 0.0.40
codegen_flags: <defaults>
</compile_context>

<pallas_src>
import jax
import jax.numpy as jnp
from jax.experimental import pallas as pl
from jax.experimental.pallas import tpu as pltpu


def _round_up(x, m):
    return ((x + m - 1) // m) * m


def _num_tensorcores():
    """Best-effort TensorCores-per-chip detection (v7x has 2, v5e/v6e have 1)."""
    try:
        kind = str(getattr(jax.devices()[0], "device_kind", "")).lower()
        if "v7" in kind or "7x" in kind:
            return 2
    except Exception:
        pass
    return 1


def mo_soft_q_kernel(x_ref, w1_ref, b1_ref, w2_ref, b2_ref, w3_ref, b3_ref,
                     out_ref):
    """Fused 3-layer MLP: relu(x@W1+b1) -> relu(.@W2+b2) -> .@W3+b3.

    x is f32 in HBM/VMEM and cast to bf16 on the VPU (free next to the MXU);
    weights are bf16; accumulation and biases are f32; intermediates are cast
    back to bf16 to keep vreg pressure low; the output is stored as bf16.
    """
    x = x_ref[...].astype(jnp.bfloat16)
    h1 = jnp.dot(x, w1_ref[...],
                 preferred_element_type=jnp.float32) + b1_ref[...]
    h1 = jnp.maximum(h1, 0.0).astype(jnp.bfloat16)
    h2 = jnp.dot(h1, w2_ref[...],
                 preferred_element_type=jnp.float32) + b2_ref[...]
    h2 = jnp.maximum(h2, 0.0).astype(jnp.bfloat16)
    logits = jnp.dot(h2, w3_ref[...],
                     preferred_element_type=jnp.float32) + b3_ref[...]
    out_ref[...] = logits.astype(out_ref.dtype)


def mo_soft_q_forward(x, params, action_dim, reward_dim, *, batch_tile=1024):
    """MOSoftQNetwork forward: returns q_values of shape (B, action_dim, reward_dim)."""
    w1, b1, w2, b2, w3, b3 = params
    B, obs = x.shape
    hid = w1.shape[1]
    out_dim = action_dim * reward_dim
    assert w3.shape[1] == out_dim

    # Batch tiling.
    #  * 1-TC chips (v5e/v6e): one maximal tile; grid=1 is fine.
    #  * 2-TC chips (v7x): even number of equal-size tiles so both TensorCores
    #    get equal work via the "parallel" batch axis.
    ncores = _num_tensorcores()
    if ncores >= 2 and B > 16:
        n_tiles = max(2, 2 * pl.cdiv(B, 2 * batch_tile))     # even, >= 2
        bt = max(16, _round_up(pl.cdiv(B, n_tiles), 16))
    else:
        bt = min(batch_tile, max(16, _round_up(B, 16)))
    Bp = _round_up(B, bt)

    # Lane-dense output: pad the logits dimension to a multiple of 128.
    out_pad = _round_up(out_dim, 128)

    # x stays f32 (cast to bf16 inside the kernel); weights go to the MXU as bf16.
    x_p = x if Bp == B else jnp.pad(x, ((0, Bp - B), (0, 0)))
    w1_b = w1.astype(jnp.bfloat16)
    w2_b = w2.astype(jnp.bfloat16)
    w3_b = jnp.pad(w3, ((0, 0), (0, out_pad - out_dim))).astype(jnp.bfloat16)
    b3_p = jnp.pad(b3, ((0, 0), (0, out_pad - out_dim)))

    grid = (Bp // bt,)

    in_specs = [
        pl.BlockSpec((bt, obs),      lambda i: (i, 0)),   # x   (batch-tiled, f32)
        pl.BlockSpec((obs, hid),     lambda i: (0, 0)),   # W1  (resident, bf16)
        pl.BlockSpec((1, hid),       lambda i: (0, 0)),   # b1  (f32)
        pl.BlockSpec((hid, hid),     lambda i: (0, 0)),   # W2
        pl.BlockSpec((1, hid),       lambda i: (0, 0)),   # b2
        pl.BlockSpec((hid, out_pad), lambda i: (0, 0)),   # W3 (N padded to 128)
        pl.BlockSpec((1, out_pad),   lambda i: (0, 0)),   # b3 (N padded to 128)
    ]
    out_spec = pl.BlockSpec((bt, out_pad), lambda i: (i, 0))

    flops = 2 * Bp * (obs * hid + hid * hid + hid * out_pad)
    bytes_accessed = (
        x_p.size * 4 + w1_b.size * 2 + w2_b.size * 2 + w3_b.size * 2
        + b1.size * 4 + b2.size * 4 + b3_p.size * 4 + Bp * out_pad * 2)

    logits = pl.pallas_call(
        mo_soft_q_kernel,
        out_shape=jax.ShapeDtypeStruct((Bp, out_pad), jnp.bfloat16),
        grid_spec=pltpu.PrefetchScalarGridSpec(
            num_scalar_prefetch=0,
            grid=grid,
            in_specs=in_specs,
            out_specs=out_spec,
        ),
        compiler_params=pltpu.CompilerParams(
            dimension_semantics=("parallel",),
            # Large batch tiles never hit this; set explicitly so v5e's 16 MiB
            # scoped default is not the silent limiter (safe on 64 MiB v7x too).
            vmem_limit_bytes=48 * 1024 * 1024),
        cost_estimate=pl.CostEstimate(
            flops=flops, transcendentals=0, bytes_accessed=bytes_accessed),
    )(x_p, w1_b, b1, w2_b, b2, w3_b, b3_p)

    q = logits[:B, :out_dim].astype(jnp.float32)
    return q.reshape(B, action_dim, reward_dim)


def init_params(key, obs_shape, action_dim, reward_dim, hidden=256):
    """Deterministic synthetic init (uniform, like torch Linear default scale)."""
    k1, k2, k3, k4, k5, k6 = jax.random.split(key, 6)

    def lin(kw, kb, fan_in, fan_out):
        bound = 1.0 / jnp.sqrt(fan_in)
        w = jax.random.uniform(kw, (fan_in, fan_out), jnp.float32, -bound, bound)
        b = jax.random.uniform(kb, (1, fan_out), jnp.float32, -bound, bound)
        return w, b

    out_dim = action_dim * reward_dim
    w1, b1 = lin(k1, k2, obs_shape, hidden)
    w2, b2 = lin(k3, k4, hidden, hidden)
    w3, b3 = lin(k5, k6, hidden, out_dim)
    return (w1, b1, w2, b2, w3, b3)


def mo_soft_q_ref(x, params, action_dim, reward_dim):
    """Pure-JAX reference mirroring the kernel's bf16-input / f32-accum / bf16-out math."""
    w1, b1, w2, b2, w3, b3 = params
    bf = jnp.bfloat16
    h1 = jnp.maximum(
        jnp.dot(x.astype(bf), w1.astype(bf),
                preferred_element_type=jnp.float32) + b1, 0.0)
    h2 = jnp.maximum(
        jnp.dot(h1.astype(bf), w2.astype(bf),
                preferred_element_type=jnp.float32) + b2, 0.0)
    q = jnp.dot(h2.astype(bf), w3.astype(bf),
                preferred_element_type=jnp.float32) + b3
    q = q.astype(bf).astype(jnp.float32)   # mirror the kernel's bf16 output store
    return q.reshape(x.shape[0], action_dim, reward_dim)


if __name__ == "__main__":
    key = jax.random.PRNGKey(0)
    kx, kp = jax.random.split(key)

    # Small shapes consistent with MOSoftQNetwork(obs_shape=16, action_dim=6, reward_dim=3)
    batch, obs_shape, action_dim, reward_dim = 32, 16, 6, 3
    x = jax.random.normal(kx, (batch, obs_shape), dtype=jnp.float32)
    params = init_params(kp, obs_shape, action_dim, reward_dim, hidden=256)

    q_values = mo_soft_q_forward(x, params, action_dim, reward_dim)
    q_values = jax.block_until_ready(q_values)

    ref = mo_soft_q_ref(x, params, action_dim, reward_dim)
    assert q_values.shape == (batch, action_dim, reward_dim)
    assert jnp.allclose(q_values, ref, atol=2e-2, rtol=2e-2), \
        "mismatch vs JAX reference"

    print("KERNEL_OK")
</pallas_src>

<mosaic_0001>
module attributes {stable_mosaic.version = 11 : i64} {
  func.func @mo_soft_q_kernel(%arg0: i32, %arg1: memref<32x16xf32, #tpu.memory_space<vmem>>, %arg2: memref<16x256xbf16, #tpu.memory_space<vmem>>, %arg3: memref<1x256xf32, #tpu.memory_space<vmem>>, %arg4: memref<256x256xbf16, #tpu.memory_space<vmem>>, %arg5: memref<1x256xf32, #tpu.memory_space<vmem>>, %arg6: memref<256x128xbf16, #tpu.memory_space<vmem>>, %arg7: memref<1x128xf32, #tpu.memory_space<vmem>>, %arg8: memref<32x128xbf16, #tpu.memory_space<vmem>>) attributes {dimension_semantics = [#tpu.dimension_semantics<parallel>], iteration_bounds = array<i64: 1>, scalar_prefetch = 0 : i64, scratch_operands = 0 : i64, tpu.core_type = #tpu.core_type<tc>, window_params = [{transform_indices = @transform_0, window_bounds = array<i64: 32, 16>}, {pipeline_mode = #tpu.pipeline_mode<synchronous>, transform_indices = @transform_1, window_bounds = array<i64: 16, 256>}, {pipeline_mode = #tpu.pipeline_mode<synchronous>, transform_indices = @transform_2, window_bounds = array<i64: 1, 256>}, {pipeline_mode = #tpu.pipeline_mode<synchronous>, transform_indices = @transform_3, window_bounds = array<i64: 256, 256>}, {pipeline_mode = #tpu.pipeline_mode<synchronous>, transform_indices = @transform_4, window_bounds = array<i64: 1, 256>}, {pipeline_mode = #tpu.pipeline_mode<synchronous>, transform_indices = @transform_5, window_bounds = array<i64: 256, 128>}, {pipeline_mode = #tpu.pipeline_mode<synchronous>, transform_indices = @transform_6, window_bounds = array<i64: 1, 128>}, {transform_indices = @transform_7, window_bounds = array<i64: 32, 128>}]} {
    %c0 = arith.constant 0 : index
    %c0_0 = arith.constant 0 : index
    %0 = vector.load %arg1[%c0, %c0_0] : memref<32x16xf32, #tpu.memory_space<vmem>>, vector<32x16xf32>
    %1 = arith.truncf %0 : vector<32x16xf32> to vector<32x16xbf16>
    %c0_1 = arith.constant 0 : index
    %c0_2 = arith.constant 0 : index
    %2 = vector.load %arg2[%c0_1, %c0_2] : memref<16x256xbf16, #tpu.memory_space<vmem>>, vector<16x256xbf16>
    %cst = arith.constant dense<0.000000e+00> : vector<32x256xf32>
    %3 = tpu.matmul %1, %2, %cst {dimension_numbers = #tpu.dot_dimension_numbers<[1], [0], [0], [1], [0, 0, 1, 1], [], []>} : vector<32x16xbf16>, vector<16x256xbf16>, vector<32x256xf32> -> vector<32x256xf32>
    %c0_3 = arith.constant 0 : index
    %c0_4 = arith.constant 0 : index
    %4 = vector.load %arg3[%c0_3, %c0_4] : memref<1x256xf32, #tpu.memory_space<vmem>>, vector<1x256xf32>
    %5 = vector.broadcast %4 : vector<1x256xf32> to vector<32x256xf32>
    %6 = arith.addf %3, %5 : vector<32x256xf32>
    %cst_5 = arith.constant 0.000000e+00 : f32
    %7 = vector.broadcast %cst_5 : f32 to vector<32x256xf32>
    %8 = arith.maximumf %6, %7 : vector<32x256xf32>
    %9 = arith.truncf %8 : vector<32x256xf32> to vector<32x256xbf16>
    %c0_6 = arith.constant 0 : index
    %c0_7 = arith.constant 0 : index
    %10 = vector.load %arg4[%c0_6, %c0_7] : memref<256x256xbf16, #tpu.memory_space<vmem>>, vector<256x256xbf16>
    %cst_8 = arith.constant dense<0.000000e+00> : vector<32x256xf32>
    %11 = tpu.matmul %9, %10, %cst_8 {dimension_numbers = #tpu.dot_dimension_numbers<[1], [0], [0], [1], [0, 0, 1, 1], [], []>} : vector<32x256xbf16>, vector<256x256xbf16>, vector<32x256xf32> -> vector<32x256xf32>
    %c0_9 = arith.constant 0 : index
    %c0_10 = arith.constant 0 : index
    %12 = vector.load %arg5[%c0_9, %c0_10] : memref<1x256xf32, #tpu.memory_space<vmem>>, vector<1x256xf32>
    %13 = vector.broadcast %12 : vector<1x256xf32> to vector<32x256xf32>
    %14 = arith.addf %11, %13 : vector<32x256xf32>
    %cst_11 = arith.constant 0.000000e+00 : f32
    %15 = vector.broadcast %cst_11 : f32 to vector<32x256xf32>
    %16 = arith.maximumf %14, %15 : vector<32x256xf32>
    %17 = arith.truncf %16 : vector<32x256xf32> to vector<32x256xbf16>
    %c0_12 = arith.constant 0 : index
    %c0_13 = arith.constant 0 : index
    %18 = vector.load %arg6[%c0_12, %c0_13] : memref<256x128xbf16, #tpu.memory_space<vmem>>, vector<256x128xbf16>
    %cst_14 = arith.constant dense<0.000000e+00> : vector<32x128xf32>
    %19 = tpu.matmul %17, %18, %cst_14 {dimension_numbers = #tpu.dot_dimension_numbers<[1], [0], [0], [1], [0, 0, 1, 1], [], []>} : vector<32x256xbf16>, vector<256x128xbf16>, vector<32x128xf32> -> vector<32x128xf32>
    %c0_15 = arith.constant 0 : index
    %c0_16 = arith.constant 0 : index
    %20 = vector.load %arg7[%c0_15, %c0_16] : memref<1x128xf32, #tpu.memory_space<vmem>>, vector<1x128xf32>
    %21 = vector.broadcast %20 : vector<1x128xf32> to vector<32x128xf32>
    %22 = arith.addf %19, %21 : vector<32x128xf32>
    %23 = arith.truncf %22 : vector<32x128xf32> to vector<32x128xbf16>
    %c0_17 = arith.constant 0 : index
    %c0_18 = arith.constant 0 : index
    %24 = vector.load %arg8[%c0_17, %c0_18] : memref<32x128xbf16, #tpu.memory_space<vmem>>, vector<32x128xbf16>
    tpu.vector_store %arg8[%c0_17, %c0_18], %23 {strides = array<i32>} : memref<32x128xbf16, #tpu.memory_space<vmem>>, vector<32x128xbf16>,
    return
  }
  func.func @transform_0(%arg0: i32) -> (i32, i32) {
    %c0_i32 = arith.constant 0 : i32
    %c0_i32_0 = arith.constant 0 : i32
    return %arg0, %c0_i32 : i32, i32
  }
  func.func @transform_1(%arg0: i32) -> (i32, i32) {
    %c0_i32 = arith.constant 0 : i32
    %c0_i32_0 = arith.constant 0 : i32
    %c0_i32_1 = arith.constant 0 : i32
    return %c0_i32, %c0_i32_0 : i32, i32
  }
  func.func @transform_2(%arg0: i32) -> (i32, i32) {
    %c0_i32 = arith.constant 0 : i32
    %c0_i32_0 = arith.constant 0 : i32
    %c0_i32_1 = arith.constant 0 : i32
    return %c0_i32, %c0_i32_0 : i32, i32
  }
  func.func @transform_3(%arg0: i32) -> (i32, i32) {
    %c0_i32 = arith.constant 0 : i32
    %c0_i32_0 = arith.constant 0 : i32
    %c0_i32_1 = arith.constant 0 : i32
    return %c0_i32, %c0_i32_0 : i32, i32
  }
  func.func @transform_4(%arg0: i32) -> (i32, i32) {
    %c0_i32 = arith.constant 0 : i32
    %c0_i32_0 = arith.constant 0 : i32
    %c0_i32_1 = arith.constant 0 : i32
    return %c0_i32, %c0_i32_0 : i32, i32
  }
  func.func @transform_5(%arg0: i32) -> (i32, i32) {
    %c0_i32 = arith.constant 0 : i32
    %c0_i32_0 = arith.constant 0 : i32
    %c0_i32_1 = arith.constant 0 : i32
    return %c0_i32, %c0_i32_0 : i32, i32
  }
  func.func @transform_6(%arg0: i32) -> (i32, i32) {
    %c0_i32 = arith.constant 0 : i32
    %c0_i32_0 = arith.constant 0 : i32
    %c0_i32_1 = arith.constant 0 : i32
    return %c0_i32, %c0_i32_0 : i32, i32
  }
  func.func @transform_7(%arg0: i32) -> (i32, i32) {
    %c0_i32 = arith.constant 0 : i32
    %c0_i32_0 = arith.constant 0 : i32
    return %arg0, %c0_i32 : i32, i32
  }
}

</mosaic_0001>

<bundles_post_ra>
// kernel: tpu_custom_call.1
= control target key start
LH: loop header
LB: loop body
LE: loop exit
PB: predicated region body
PF: predicated region fallthrough
CT: control target
= control target key end

     0   :  { %12 = vsyncpa [#allocation3], 0  ;;  %s1015_s0 = inlined_call_operand.vmem [shape: f32[32,16], index: 0, kind: input, shape index: {}]   ;;  %s1016_s1 = inlined_call_operand.vmem [shape: bf16[16,256], index: 1, kind: input, shape index: {}]   ;;  %s1017_s2 = inlined_call_operand.vmem [shape: f32[1,256], index: 2, kind: input, shape index: {}]   ;;  %s1018_s3 = inlined_call_operand.hbm [shape: bf16[256,256], index: 3, kind: input, shape index: {}]   ;;  %s1019_s4 = inlined_call_operand.vmem [shape: f32[1,256], index: 4, kind: input, shape index: {}]   ;;  %s1020_s5 = inlined_call_operand.hbm [shape: bf16[256,128], index: 5, kind: input, shape index: {}]   ;;  %s1021_s6 = inlined_call_operand.vmem [shape: f32[1,128], index: 6, kind: input, shape index: {}]   ;;  %s1022_s7 = inlined_call_operand.hbm [shape: bf16[32,128], index: 7, kind: output, shape index: {}]  }
   0x1   :  { %13 = vsyncpa [#allocation6], 0 }
   0x2   :  { %14 = vsyncpa [#allocation4], 0  ;;  %s896_s24 = smov [#allocation2]   ;;  %s824_s28 = scalar_lea.hbm %s1018_s3, 4096 }
   0x3   :  { %s26_s25 = sshll.u32 %s896_s24, 4  ;;  %p825_p0 = scmp.ne.s32.totalorder %s1018_s3, %s824_s28  ;;  %s27_s25 = int_to_ptr.vmem [resolvable:$true] %s26_s25 }
   0x4   :  { %p828_p1 = scmp.lt.u32.totalorder %s824_s28, %s1018_s3 }
   0x6   :  { %p830_p2 = pnand %p828_p1, %p825_p0 }
   0x8   :  { %833 = shalt.err (!%p830_p2)
}
   0x9   :  { %s834_s10 = scalar_lea.vmem %s27_s25, 4096  ;;  %p839_p4 = scmp.lt.s32.totalorder %s27_s25, %s27_s25 }
   0xa   :  { %p835_p3 = scmp.ne.s32.totalorder %s27_s25, %s834_s10  ;;  %p840_p5 = scmp.lt.s32.totalorder %s834_s10, %s834_s10 }
   0xc   :  { %p841_p6 = por %p840_p5, %p839_p4 }
   0xe   :  { %p842_p7 = pnand %p841_p6, %p835_p3 }
  0x10   :  { %845 = shalt.err (!%p842_p7)
}
  0x11   :  { %s897_s11 = smov 128   ;;  %s898_s12 = smov 8  }
  0x12   :  { %32 = dma.hbm_to_vmem [thread:$0]  %s1018_s3, 4096, %s27_s25, [#allocation3], %s897_s11, %s897_s11, %s898_s12  }
  0x13   :  { %s899_s15 = smov [#allocation5]   ;;  %s846_s19 = scalar_lea.hbm %s1020_s5, 2048 }
  0x14   :  { %s40_s16 = sshll.u32 %s899_s15, 4  ;;  %p847_p8 = scmp.ne.s32.totalorder %s1020_s5, %s846_s19  ;;  %s41_s16 = int_to_ptr.vmem [resolvable:$true] %s40_s16 }
  0x15   :  { %p850_p9 = scmp.lt.u32.totalorder %s846_s19, %s1020_s5 }
  0x17   :  { %p852_p10 = pnand %p850_p9, %p847_p8 }
  0x19   :  { %855 = shalt.err (!%p852_p10)
}
  0x1a   :  { %s856_s24 = scalar_lea.vmem %s41_s16, 2048  ;;  %p861_p12 = scmp.lt.s32.totalorder %s41_s16, %s41_s16 }
  0x1b   :  { %p857_p11 = scmp.ne.s32.totalorder %s41_s16, %s856_s24  ;;  %p862_p13 = scmp.lt.s32.totalorder %s856_s24, %s856_s24 }
  0x1d   :  { %p863_p0 = por %p862_p13, %p861_p12 }
  0x1f   :  { %p864_p1 = pnand %p863_p0, %p857_p11 }
  0x21   :  { %867 = shalt.err (!%p864_p1)
}
  0x22   :  { %s900_s3 = smov 64   ;;  %s901_s25 = smov 4  }
  0x23   :  { %46 = dma.hbm_to_vmem [thread:$0]  %s1020_s5, 2048, %s41_s16, [#allocation6], %s900_s3, %s900_s3, %s901_s25  }
  0x24   :  { %890 = dma.done.wait [#allocation3], 4096  }
  0x25   :  { %891 = vsyncadd [#allocation3], 4294963200 }
  0x26   :  { %892 = dma.done.wait [#allocation6], 2048  }
  0x27   :  { %893 = vsyncadd [#allocation6], 4294965248  ;;  %v902_v0 = vmov 0   ;;  %v757_v1 = vld [vmem:[%s1016_s1 + $0x4] ss:$8 sps:$4 sm:$0xff]   ;;  %vm86_vm0 = vcmask 130048   ;;  %v66_v52 = vlaneseq }
  0x28   :  { %125 = vmatprep.mubr.bf16.mxu0 %v902_v0  ;;  %v759_v2 = vld [vmem:[%s1016_s1] ss:$8 sps:$4 sm:$0xff]   ;;  %93 = vmatprep.subr.bf16.mxu0 %v757_v1  ;;  %v760_v6 = vld [vmem:[#allocation2 + $0x4] ss:$8 sps:$4 sm:$0xff]   ;;  %v763_v8 = vld [vmem:[#allocation2 + $0x14] ss:$8 sps:$4 sm:$0xff]  }
  0x29   :  { %v56_v3 = vld [vmem:[%s1015_s0] sm:$0xff]  ;;  %v57_v4 = vld [vmem:[%s1015_s0 + $0x8] sm:$0xff]  ;;  %94 = vmatpush1.bf16.msra.mxu0 %v759_v2  ;;  %362 = vmatprep.subr.bf16.mxu1 %v760_v6  ;;  %v58_v9 = vld [vmem:[%s1015_s0 + $0x10] sm:$0xff]  ;;  %v67_v53 = vshrl.u32 %v66_v52, 7  ;;  %s903_s18 = smov [#allocation7]  }
  0x2a   :  { %v60_v5 = vpack.c.bf16 %v57_v4, %v56_v3  ;;  %v762_v7 = vld [vmem:[#allocation2] ss:$8 sps:$4 sm:$0xff]   ;;  %v765_v10 = vld [vmem:[#allocation2 + $0x10] ss:$8 sps:$4 sm:$0xff]   ;;  %v766_v12 = vld [vmem:[#allocation2 + $0x24] ss:$8 sps:$4 sm:$0xff]  }
  0x2b   :  { %363 = vmatpush1.bf16.msra.mxu1 %v762_v7  ;;  %v59_v11 = vld [vmem:[%s1015_s0 + $0x18] sm:$0xff]  ;;  %v768_v14 = vld [vmem:[#allocation2 + $0x20] ss:$8 sps:$4 sm:$0xff]   ;;  %v772_v17 = vld [vmem:[#allocation2 + $0x44] ss:$8 sps:$4 sm:$0xff]   ;;  %v68_v54 = vsub.s32 0, %v67_v53 }
  0x2c   :  { %651 = vmatmul.mubr.msk.bf16.vlgmr.msra.gmra.mrb[0].mxu0 %vm86_vm0, %v60_v5  ;;  %364 = vmatprep.subr.bf16.mxu1 %v763_v8  ;;  %v61_v13 = vpack.c.bf16 %v59_v11, %v58_v9  ;;  %v769_v15 = vld [vmem:[#allocation2 + $0x34] ss:$8 sps:$4 sm:$0xff]   ;;  %v771_v16 = vld [vmem:[#allocation2 + $0x30] ss:$8 sps:$4 sm:$0xff]   ;;  %v774_v18 = vld [vmem:[#allocation2 + $0x40] ss:$8 sps:$4 sm:$0xff]  }
  0x2d   :  { %135 = vmatprep.mubr.bf16.mxu0 %v902_v0  ;;  %v775_v19 = vld [vmem:[#allocation2 + $0x54] ss:$8 sps:$4 sm:$0xff]   ;;  %v777_v20 = vld [vmem:[#allocation2 + $0x50] ss:$8 sps:$4 sm:$0xff]   ;;  %v778_v21 = vld [vmem:[#allocation2 + $0x64] ss:$8 sps:$4 sm:$0xff]  }
  0x2e   :  { %v780_v22 = vld [vmem:[#allocation2 + $0x60] ss:$8 sps:$4 sm:$0xff]   ;;  %v781_v23 = vld [vmem:[#allocation2 + $0x74] ss:$8 sps:$4 sm:$0xff]   ;;  %v783_v24 = vld [vmem:[#allocation2 + $0x70] ss:$8 sps:$4 sm:$0xff]  }
  0x2f   :  { %365 = vmatpush1.bf16.msra.mxu1 %v765_v10  ;;  %v784_v25 = vld [vmem:[#allocation2 + $0x84] ss:$8 sps:$4 sm:$0xff]   ;;  %v786_v26 = vld [vmem:[#allocation2 + $0x80] ss:$8 sps:$4 sm:$0xff]   ;;  %v787_v27 = vld [vmem:[#allocation2 + $0x94] ss:$8 sps:$4 sm:$0xff]  }
  0x30   :  { %366 = vmatprep.subr.bf16.mxu1 %v766_v12  ;;  %v789_v28 = vld [vmem:[#allocation2 + $0x90] ss:$8 sps:$4 sm:$0xff]   ;;  %v790_v29 = vld [vmem:[#allocation2 + $0xa4] ss:$8 sps:$4 sm:$0xff]   ;;  %v792_v30 = vld [vmem:[#allocation2 + $0xa0] ss:$8 sps:$4 sm:$0xff]  }
  0x31   :  { %v793_v31 = vld [vmem:[#allocation2 + $0xb4] ss:$8 sps:$4 sm:$0xff]   ;;  %v795_v32 = vld [vmem:[#allocation2 + $0xb0] ss:$8 sps:$4 sm:$0xff]   ;;  %v796_v33 = vld [vmem:[#allocation2 + $0xc4] ss:$8 sps:$4 sm:$0xff]  }
  0x32   :  { %v798_v34 = vld [vmem:[#allocation2 + $0xc0] ss:$8 sps:$4 sm:$0xff]   ;;  %v799_v35 = vld [vmem:[#allocation2 + $0xd4] ss:$8 sps:$4 sm:$0xff]   ;;  %v801_v36 = vld [vmem:[#allocation2 + $0xd0] ss:$8 sps:$4 sm:$0xff]  }
  0x33   :  { %367 = vmatpush1.bf16.msra.mxu1 %v768_v14  ;;  %v802_v37 = vld [vmem:[#allocation2 + $0xe4] ss:$8 sps:$4 sm:$0xff]   ;;  %v804_v38 = vld [vmem:[#allocation2 + $0xe0] ss:$8 sps:$4 sm:$0xff]   ;;  %v805_v39 = vld [vmem:[#allocation2 + $0xf4] ss:$8 sps:$4 sm:$0xff]  }
  0x34   :  { %652 = vmatmul.mubr.msk.bf16.gmra.mrb[4].mxu0 %vm86_vm0, %v61_v13  ;;  %368 = vmatprep.subr.bf16.mxu1 %v769_v15  ;;  %v807_v40 = vld [vmem:[#allocation2 + $0xf0] ss:$8 sps:$4 sm:$0xff]   ;;  %v808_v41 = vld [vmem:[#allocation5 + $0x40] sm:$0xff]   ;;  %v810_v43 = vld [vmem:[#allocation5 + $0x48] sm:$0xff]   ;;  %v72_v56 = vsub.s32 1, %v67_v53  ;;  %s636_s19 = sshll.u32 %s903_s18, 4  ;;  %s637_s19 = int_to_ptr.vmem [resolvable:$true] %s636_s19 }
  0x35   :  { %v809_v42 = vld [vmem:[#allocation5] sm:$0xff]   ;;  %721 = vmatprep.subr.bf16.mxu0 %v808_v41  ;;  %v811_v44 = vld [vmem:[#allocation5 + $0x8] sm:$0xff]   ;;  %v812_v45 = vld [vmem:[#allocation5 + $0x50] sm:$0xff]   ;;  %p873_p3 = scmp.lt.s32.totalorder %s637_s19, %s637_s19 }
  0x36   :  { %722 = vmatpush3.bf16.msra.mxu0 %v809_v42  ;;  %v813_v46 = vld [vmem:[#allocation5 + $0x10] sm:$0xff]   ;;  %v814_v47 = vld [vmem:[#allocation5 + $0x58] sm:$0xff]   ;;  %v816_v49 = vld [vmem:[#allocation5 + $0x60] sm:$0xff]  }
  0x37   :  { %369 = vmatpush1.bf16.msra.mxu1 %v771_v16  ;;  %723 = vmatprep.subr.bf16.mxu0 %v810_v43  ;;  %v815_v48 = vld [vmem:[#allocation5 + $0x18] sm:$0xff]   ;;  %v817_v50 = vld [vmem:[#allocation5 + $0x20] sm:$0xff]   ;;  %v818_v51 = vld [vmem:[#allocation5 + $0x68] sm:$0xff]  }
  0x38   :  { %370 = vmatprep.subr.bf16.mxu1 %v772_v17  ;;  %v64_v55 = vld [vmem:[%s1017_s2] sm:$0x3] }
  0x39   :  { %v69_v57 = vrot.slane %v64_v55, %v68_v54  ;;  %v73_v58 = vrot.slane %v64_v55, %v72_v56 }
  0x3a   :  { %724 = vmatpush3.bf16.msra.mxu0 %v811_v44 }
  0x3b   :  { %371 = vmatpush1.bf16.msra.mxu1 %v774_v18  ;;  %725 = vmatprep.subr.bf16.mxu0 %v812_v45 }
  0x3c   :  { %372 = vmatprep.subr.bf16.mxu1 %v775_v19 }
  0x3e   :  { %726 = vmatpush3.bf16.msra.mxu0 %v813_v46 }
  0x3f   :  { %373 = vmatpush1.bf16.msra.mxu1 %v777_v20  ;;  %727 = vmatprep.subr.bf16.mxu0 %v814_v47 }
  0x40   :  { %374 = vmatprep.subr.bf16.mxu1 %v778_v21 }
  0x42   :  { %728 = vmatpush3.bf16.msra.mxu0 %v815_v48 }
  0x43   :  { %375 = vmatpush1.bf16.msra.mxu1 %v780_v22  ;;  %729 = vmatprep.subr.bf16.mxu0 %v816_v49 }
  0x44   :  { %376 = vmatprep.subr.bf16.mxu1 %v781_v23  ;;  %v819_v23 = vld [vmem:[#allocation5 + $0x28] sm:$0xff]  }
  0x46   :  { %730 = vmatpush3.bf16.msra.mxu0 %v817_v50 }
  0x47   :  { %377 = vmatpush1.bf16.msra.mxu1 %v783_v24  ;;  %731 = vmatprep.subr.bf16.mxu0 %v818_v51  ;;  %v820_v24 = vld [vmem:[#allocation5 + $0x70] sm:$0xff]  }
  0x48   :  { %378 = vmatprep.subr.bf16.mxu1 %v784_v25  ;;  %v821_v25 = vld [vmem:[#allocation5 + $0x30] sm:$0xff]  }
  0x4a   :  { %732 = vmatpush3.bf16.msra.mxu0 %v819_v23 }
  0x4b   :  { %379 = vmatpush1.bf16.msra.mxu1 %v786_v26  ;;  %733 = vmatprep.subr.bf16.mxu0 %v820_v24  ;;  %v822_v26 = vld [vmem:[#allocation5 + $0x78] sm:$0xff]  }
  0x4c   :  { %380 = vmatprep.subr.bf16.mxu1 %v787_v27  ;;  %v823_v27 = vld [vmem:[#allocation5 + $0x38] sm:$0xff]  }
  0x4e   :  { %734 = vmatpush3.bf16.msra.mxu0 %v821_v25 }
  0x4f   :  { %381 = vmatpush1.bf16.msra.mxu1 %v789_v28  ;;  %735 = vmatprep.subr.bf16.mxu0 %v822_v26  ;;  %v190_v28 = vld [vmem:[%s1019_s4] sm:$0x3] }
  0x50   :  { %382 = vmatprep.subr.bf16.mxu1 %v790_v29  ;;  %v195_v29 = vrot.slane %v190_v28, %v68_v54 }
  0x52   :  { %736 = vmatpush3.bf16.msra.mxu0 %v823_v27 }
  0x53   :  { %383 = vmatpush1.bf16.msra.mxu1 %v792_v30  ;;  %v199_v30 = vrot.slane %v190_v28, %v72_v56 }
  0x54   :  { %384 = vmatprep.subr.bf16.mxu1 %v793_v31 }
  0x57   :  { %385 = vmatpush1.bf16.msra.mxu1 %v795_v32 }
  0x58   :  { %386 = vmatprep.subr.bf16.mxu1 %v796_v33 }
  0x5b   :  { %387 = vmatpush1.bf16.msra.mxu1 %v798_v34 }
  0x5c   :  { %388 = vmatprep.subr.bf16.mxu1 %v799_v35 }
  0x5f   :  { %389 = vmatpush1.bf16.msra.mxu1 %v801_v36 }
  0x60   :  { %390 = vmatprep.subr.bf16.mxu1 %v802_v37 }
  0x63   :  { %391 = vmatpush1.bf16.msra.mxu1 %v804_v38 }
  0x64   :  { %392 = vmatprep.subr.bf16.mxu1 %v805_v39 }
  0x67   :  { %393 = vmatpush1.bf16.msra.mxu1 %v807_v40 }
  0xff   :  { %v127_v59 = vpop.f32.mrb[0].mxu0 }
 0x100   :  { %v128_v60 = vadd.f32 %v127_v59, %v69_v57  ;;  %v129_v61 = vpop.f32.mrb[1].mxu0 }
 0x101   :  { %v130_v62 = vadd.f32 %v129_v61, %v73_v58  ;;  %v131_v63 = vpop.f32.mrb[2].mxu0 }
 0x102   :  { %v132_v0 = vadd.f32 %v131_v63, %v69_v57  ;;  %v133_v1 = vpop.f32.mrb[3].mxu0  ;;  %v146_v3 = vmax.f32 %v128_v60, 0.0  ;;  %v685_v63 = vld [vmem:[%s1021_s6] ss:$0 sm:$0xff]  ;;  %s868_s6 = scalar_lea.vmem %s637_s19, 256 }
 0x103   :  { %v134_v2 = vadd.f32 %v133_v1, %v73_v58  ;;  %v147_v5 = vmax.f32 %v130_v62, 0.0  ;;  %p869_p2 = scmp.ne.s32.totalorder %s637_s19, %s868_s6  ;;  %p874_p4 = scmp.lt.s32.totalorder %s868_s6, %s868_s6 }
 0x104   :  { %v148_v4 = vmax.f32 %v132_v0, 0.0 }
 0x105   :  { %v149_v6 = vmax.f32 %v134_v2, 0.0  ;;  %p875_p5 = por %p874_p4, %p873_p3 }
 0x106   :  { %v154_v7 = vpack.c.bf16 %v148_v4, %v146_v3 }
 0x107   :  { %v137_v8 = vpop.f32.mrb[4].mxu0  ;;  %v155_v9 = vpack.c.bf16 %v149_v6, %v147_v5  ;;  %p876_p6 = pnand %p875_p5, %p869_p2 }
 0x108   :  { %v138_v10 = vadd.f32 %v137_v8, %v69_v57  ;;  %v139_v11 = vpop.f32.mrb[5].mxu0 }
 0x109   :  { %v140_v12 = vadd.f32 %v139_v11, %v73_v58  ;;  %v141_v13 = vpop.f32.mrb[6].mxu0  ;;  %394 = vmatprep.mubr.bf16.mxu1 %v155_v9 }
 0x10a   :  { %v142_v14 = vadd.f32 %v141_v13, %v69_v57  ;;  %v143_v15 = vpop.f32.mrb[7].mxu0  ;;  %395 = vmatmul.mubr.bf16.vlgmr.msra.gmra.mrb[0].mxu1 %v154_v7  ;;  %v150_v17 = vmax.f32 %v138_v10, 0.0 }
 0x10b   :  { %v144_v16 = vadd.f32 %v143_v15, %v73_v58  ;;  %v151_v19 = vmax.f32 %v140_v12, 0.0 }
 0x10c   :  { %v152_v18 = vmax.f32 %v142_v14, 0.0 }
 0x10d   :  { %v153_v20 = vmax.f32 %v144_v16, 0.0 }
 0x10e   :  { %v156_v21 = vpack.c.bf16 %v152_v18, %v150_v17 }
 0x10f   :  { %v157_v22 = vpack.c.bf16 %v153_v20, %v151_v19 }
 0x111   :  { %404 = vmatprep.mubr.bf16.mxu1 %v157_v22 }
 0x112   :  { %405 = vmatmul.mubr.bf16.gmra.mrb[4].mxu1 %v156_v21 }
 0x1dd   :  { %v396_v31 = vpop.f32.mrb[0].mxu1 }
 0x1de   :  { %v397_v32 = vadd.f32 %v396_v31, %v195_v29  ;;  %v398_v33 = vpop.f32.mrb[1].mxu1 }
 0x1df   :  { %v399_v34 = vadd.f32 %v398_v33, %v199_v30  ;;  %v400_v35 = vpop.f32.mrb[2].mxu1 }
 0x1e0   :  { %v401_v36 = vadd.f32 %v400_v35, %v195_v29  ;;  %v402_v37 = vpop.f32.mrb[3].mxu1  ;;  %v415_v39 = vmax.f32 %v397_v32, 0.0 }
 0x1e1   :  { %v403_v38 = vadd.f32 %v402_v37, %v199_v30  ;;  %v416_v41 = vmax.f32 %v399_v34, 0.0 }
 0x1e2   :  { %v417_v40 = vmax.f32 %v401_v36, 0.0 }
 0x1e3   :  { %v418_v42 = vmax.f32 %v403_v38, 0.0 }
 0x1e4   :  { %v423_v43 = vpack.c.bf16 %v417_v40, %v415_v39 }
 0x1e5   :  { %v424_v44 = vpack.c.bf16 %v418_v42, %v416_v41  ;;  %v406_v45 = vpop.f32.mrb[4].mxu1 }
 0x1e6   :  { %v407_v46 = vadd.f32 %v406_v45, %v195_v29  ;;  %v408_v47 = vpop.f32.mrb[5].mxu1 }
 0x1e7   :  { %v409_v48 = vadd.f32 %v408_v47, %v199_v30  ;;  %v410_v49 = vpop.f32.mrb[6].mxu1  ;;  %594 = vmatprep.mubr.bf16.mxu0 %v424_v44 }
 0x1e8   :  { %v411_v50 = vadd.f32 %v410_v49, %v195_v29  ;;  %v412_v51 = vpop.f32.mrb[7].mxu1  ;;  %595 = vmatmul.mubr.bf16.vlgmr.msra.gmra.mrb[8].mxu0 %v423_v43  ;;  %v419_v53 = vmax.f32 %v407_v46, 0.0 }
 0x1e9   :  { %v413_v52 = vadd.f32 %v412_v51, %v199_v30  ;;  %v420_v55 = vmax.f32 %v409_v48, 0.0 }
 0x1ea   :  { %v421_v54 = vmax.f32 %v411_v50, 0.0 }
 0x1eb   :  { %v422_v56 = vmax.f32 %v413_v52, 0.0 }
 0x1ec   :  { %v425_v57 = vpack.c.bf16 %v421_v54, %v419_v53 }
 0x1ed   :  { %v426_v58 = vpack.c.bf16 %v422_v56, %v420_v55 }
 0x1ef   :  { %602 = vmatprep.mubr.bf16.mxu0 %v426_v58 }
 0x1f0   :  { %603 = vmatmul.mubr.bf16.gmra.mrb[12].mxu0 %v425_v57 }
 0x2bb   :  { %v737_v59 = vpop.f32.mrb[8].mxu0 }
 0x2bc   :  { %v738_v60 = vpop.f32.mrb[9].mxu0 }
 0x2bd   :  { %v739_v61 = vadd.f32 %v738_v60, %v737_v59  ;;  %v740_v62 = vpop.f32.mrb[10].mxu0 }
 0x2be   :  { %v741_v0 = vpop.f32.mrb[11].mxu0 }
 0x2bf   :  { %v742_v1 = vadd.f32 %v741_v0, %v740_v62  ;;  %v597_v2 = vadd.f32 %v739_v61, %v685_v63 }
 0x2c1   :  { %v600_v3 = vadd.f32 %v742_v1, %v685_v63 }
 0x2c3   :  { %v713_v4 = vpack.c.bf16 %v600_v3, %v597_v2  ;;  %v743_v5 = vpop.f32.mrb[12].mxu0 }
 0x2c4   :  { %v744_v6 = vpop.f32.mrb[13].mxu0 }
 0x2c5   :  { %714 = vst [vmem:[#allocation7] sm:$0xff] %v713_v4   ;;  %v745_v7 = vadd.f32 %v744_v6, %v743_v5  ;;  %v746_v8 = vpop.f32.mrb[14].mxu0 }
 0x2c6   :  { %v747_v9 = vpop.f32.mrb[15].mxu0 }
 0x2c7   :  { %v748_v10 = vadd.f32 %v747_v9, %v746_v8  ;;  %v605_v11 = vadd.f32 %v745_v7, %v685_v63 }
 0x2c9   :  { %v608_v12 = vadd.f32 %v748_v10, %v685_v63 }
 0x2cb   :  { %v718_v13 = vpack.c.bf16 %v608_v12, %v605_v11 }
 0x2cd   :  { %720 = vst [vmem:[#allocation7 + $0x8] sm:$0xff] %v718_v13  }
 0x2ce   :  { %879 = shalt.err (!%p876_p6)
}
 0x2cf   :  { %s880_s22 = scalar_lea.hbm %s1022_s7, 256 }
 0x2d0   :  { %p881_p7 = scmp.ne.s32.totalorder %s1022_s7, %s880_s22  ;;  %p884_p8 = scmp.lt.u32.totalorder %s880_s22, %s1022_s7 }
 0x2d2   :  { %p886_p9 = pnand %p884_p8, %p881_p7 }
 0x2d4   :  { %889 = shalt.err (!%p886_p9)
}
 0x2d5   :  { %642 = dma.vmem_to_hbm [thread:$0]  %s637_s19, 256, %s1022_s7, [#allocation4], %s900_s3, %s900_s3, %s901_s25  }
 0x2d6   :  { %894 = dma.done.wait [#allocation4], 256  }
 0x2d7   :  { %895 = vsyncadd [#allocation4], 4294967040 }
 0x2d8   :  { %646 = vsyncpa [#allocation3], 1 }
 0x2d9   :  { %647 = vsyncpa [#allocation6], 1 }
 0x2da   :  { %648 = vsyncpa [#allocation4], 1 }

</bundles_post_ra>
